<compile_context>
chip_gen: v5e
topology: v5e:2x2
jax: 0.10.0
libtpu: 0.0.40
codegen_flags: <defaults>
</compile_context>

<pallas_src>
import jax
import jax.numpy as jnp
from jax.experimental import pallas as pl
from jax.experimental.pallas import tpu as pltpu


def _ceil_to(x, m):
    return -(-x // m) * m


def _cdiv(a, b):
    return -(-a // b)


def _vmem_capacity_bytes():
    """Physical per-core VMEM (64 MiB on v7x, 128 MiB on v5e/v6e), safe fallback."""
    try:
        info = pltpu.get_tpu_info()
        cap = getattr(info, "vmem_capacity_bytes", None)
        if cap:
            return int(cap)
    except Exception:
        pass
    return 64 * 1024 * 1024  # conservative: v7x per-TensorCore VMEM


def _select_tiles(N, Cin, Cout, HW):
    """Pick (nb, tn, vmem_limit_bytes) for the (batch-slab, spatial) tiling.

    Per-step pipelined VMEM ~= 2 (double buffer) * nb * tn
                               * (ceil8(Cin) + ceil8(Cout)) * 4 B.
    """
    cap = _vmem_capacity_bytes()
    budget = int(cap * 0.4)  # headroom for residents / compiler scratch

    row_bytes = (_ceil_to(Cin, 8) + _ceil_to(Cout, 8)) * 4  # f32, sublane-padded

    def step_bytes(nb, tn):
        return 2 * nb * tn * row_bytes  # double-buffered x-in + out blocks

    # 1) Spatial (lane) tile: full HW when it fits, else largest 128-multiple.
    if step_bytes(1, HW) <= budget:
        tn = HW
    else:
        tn = max(128, (budget // (2 * row_bytes)) // 128 * 128)
        tn = min(tn, HW)

    # 2) Batch slab: fold nb batches into one step within the budget.
    nb = max(1, min(N, budget // max(step_bytes(1, tn), 1)))

    # 3) Guarantee >=2 grid blocks so both v7x TensorCores get work.
    if _cdiv(N, nb) * _cdiv(HW, tn) < 2:
        if N >= 2:
            nb = _cdiv(N, 2)
        elif HW >= 256:
            tn = _ceil_to(_cdiv(HW, 2), 128)

    # VMEM limit: actual pipelined buffers + resident weight/bias + headroom,
    # clamped below the physical capacity of this generation.
    resident = (_ceil_to(Cout, 8) * max(_ceil_to(Cin, 128), 128)
                + _ceil_to(Cout, 8) * 128) * 4
    vmem_limit = step_bytes(nb, tn) + resident + (16 << 20)
    vmem_limit = min(vmem_limit, cap - (4 << 20))
    vmem_limit = max(vmem_limit, 32 << 20)
    vmem_limit = min(vmem_limit, cap)
    return nb, tn, int(vmem_limit)


def _outconv_kernel(w_ref, b_ref, x_ref, o_ref):
    # w: (Cout, Cin), b: (Cout, 1), x: (nb, Cin, tn), o: (nb, Cout, tn)
    w = w_ref[...]
    b = b_ref[...]
    nb = x_ref.shape[0]
    for i in range(nb):  # static unroll over the (small) batch slab
        acc = jnp.dot(w, x_ref[i], preferred_element_type=jnp.float32)
        o_ref[i] = (acc + b).astype(o_ref.dtype)


@jax.jit
def outconv_forward(x_nchw, weight, bias):
    """1x1 conv (nn.Conv2d(kernel_size=1)) forward.

    x_nchw: (N, Cin, H, W) f32; weight: (Cout, Cin, 1, 1) f32; bias: (Cout,) f32
    returns (N, Cout, H, W) f32.
    """
    N, Cin, H, W = x_nchw.shape
    Cout = weight.shape[0]
    HW = H * W

    # Free reshapes (no data movement): NCHW is already (N, Cin, H*W)-contiguous.
    x3 = x_nchw.reshape(N, Cin, HW)
    w_mat = weight.reshape(Cout, Cin)
    b_col = bias.reshape(Cout, 1)

    nb, tn, vmem_limit = _select_tiles(N, Cin, Cout, HW)
    grid = (_cdiv(N, nb), _cdiv(HW, tn))

    itemsize = x3.dtype.itemsize
    cost = pl.CostEstimate(
        flops=2 * N * HW * Cin * Cout,
        transcendentals=0,
        bytes_accessed=(N * Cin * HW + Cout * Cin + Cout + N * Cout * HW) * itemsize,
    )

    out3 = pl.pallas_call(
        _outconv_kernel,
        out_shape=jax.ShapeDtypeStruct((N, Cout, HW), x_nchw.dtype),
        grid_spec=pltpu.PrefetchScalarGridSpec(
            num_scalar_prefetch=0,
            grid=grid,
            in_specs=[
                pl.BlockSpec((Cout, Cin), lambda n, j: (0, 0)),       # weight (resident)
                pl.BlockSpec((Cout, 1), lambda n, j: (0, 0)),         # bias   (resident)
                pl.BlockSpec((nb, Cin, tn), lambda n, j: (n, 0, j)),  # x slab
            ],
            out_specs=pl.BlockSpec((nb, Cout, tn), lambda n, j: (n, 0, j)),
        ),
        compiler_params=pltpu.CompilerParams(
            dimension_semantics=("parallel", "parallel"),
            vmem_limit_bytes=vmem_limit,
        ),
        cost_estimate=cost,
    )(w_mat, b_col, x3)

    return out3.reshape(N, Cout, H, W)


if __name__ == "__main__":
    key = jax.random.PRNGKey(0)
    k_x, k_w, k_b = jax.random.split(key, 3)

    N, Cin, H, W = 2, 4, 16, 16
    Cout = 3

    # Deterministic params mimicking PyTorch Conv2d default init:
    # uniform(-1/sqrt(fan_in), 1/sqrt(fan_in)), fan_in = Cin * 1 * 1.
    bound = 1.0 / jnp.sqrt(jnp.float32(Cin))
    weight = jax.random.uniform(k_w, (Cout, Cin, 1, 1), jnp.float32,
                                minval=-bound, maxval=bound)
    bias = jax.random.uniform(k_b, (Cout,), jnp.float32,
                              minval=-bound, maxval=bound)
    x = jax.random.normal(k_x, (N, Cin, H, W), jnp.float32)

    y = jax.block_until_ready(outconv_forward(x, weight, bias))
    y_ref = jnp.einsum("nchw,oc->nohw", x, weight.reshape(Cout, Cin)) \
        + bias.reshape(1, Cout, 1, 1)
    assert y.shape == (N, Cout, H, W)
    assert jnp.allclose(y, y_ref, atol=1e-5, rtol=1e-5)

    # Ragged-shape sanity check: HW not a multiple of the lane tile, channels
    # not multiples of 8 (exercises the masked boundary blocks).
    N2, Cin2, Cout2, H2, W2 = 1, 5, 2, 20, 20
    kx2, kw2, kb2 = jax.random.split(jax.random.PRNGKey(1), 3)
    w2 = jax.random.uniform(kw2, (Cout2, Cin2, 1, 1), jnp.float32, minval=-1., maxval=1.)
    b2 = jax.random.uniform(kb2, (Cout2,), jnp.float32, minval=-1., maxval=1.)
    x2 = jax.random.normal(kx2, (N2, Cin2, H2, W2), jnp.float32)
    y2 = jax.block_until_ready(outconv_forward(x2, w2, b2))
    y2_ref = jnp.einsum("nchw,oc->nohw", x2, w2.reshape(Cout2, Cin2)) \
        + b2.reshape(1, Cout2, 1, 1)
    assert jnp.allclose(y2, y2_ref, atol=1e-5, rtol=1e-5)

    print("KERNEL_OK")
</pallas_src>

<mosaic_0001>
module attributes {stable_mosaic.version = 11 : i64} {
  func.func @_outconv_kernel(%arg0: i32, %arg1: i32, %arg2: memref<3x4xf32, #tpu.memory_space<vmem>>, %arg3: memref<3x1xf32, #tpu.memory_space<vmem>>, %arg4: memref<1x4x256xf32, #tpu.memory_space<vmem>>, %arg5: memref<1x3x256xf32, #tpu.memory_space<vmem>>) attributes {dimension_semantics = [#tpu.dimension_semantics<parallel>, #tpu.dimension_semantics<parallel>], iteration_bounds = array<i64: 2, 1>, scalar_prefetch = 0 : i64, scratch_operands = 0 : i64, tpu.core_type = #tpu.core_type<tc>, window_params = [{pipeline_mode = #tpu.pipeline_mode<synchronous>, transform_indices = @transform_0, window_bounds = array<i64: 3, 4>}, {pipeline_mode = #tpu.pipeline_mode<synchronous>, transform_indices = @transform_1, window_bounds = array<i64: 3, 1>}, {transform_indices = @transform_2, window_bounds = array<i64: 1, 4, 256>}, {transform_indices = @transform_3, window_bounds = array<i64: 1, 3, 256>}]} {
    %c0 = arith.constant 0 : index
    %c0_0 = arith.constant 0 : index
    %0 = vector.load %arg2[%c0, %c0_0] : memref<3x4xf32, #tpu.memory_space<vmem>>, vector<3x4xf32>
    %c0_1 = arith.constant 0 : index
    %c0_2 = arith.constant 0 : index
    %1 = vector.load %arg3[%c0_1, %c0_2] : memref<3x1xf32, #tpu.memory_space<vmem>>, vector<3x1xf32>
    %c0_3 = arith.constant 0 : index
    %c0_4 = arith.constant 0 : index
    %c0_5 = arith.constant 0 : index
    %2 = vector.load %arg4[%c0_3, %c0_4, %c0_5] : memref<1x4x256xf32, #tpu.memory_space<vmem>>, vector<1x4x256xf32>
    %3 = vector.shape_cast %2 : vector<1x4x256xf32> to vector<4x256xf32>
    %cst = arith.constant dense<0.000000e+00> : vector<3x256xf32>
    %4 = tpu.matmul %0, %3, %cst {dimension_numbers = #tpu.dot_dimension_numbers<[1], [0], [0], [1], [0, 0, 1, 1], [], []>} : vector<3x4xf32>, vector<4x256xf32>, vector<3x256xf32> -> vector<3x256xf32>
    %5 = vector.broadcast %1 : vector<3x1xf32> to vector<3x256xf32>
    %6 = arith.addf %4, %5 : vector<3x256xf32>
    %c0_6 = arith.constant 0 : index
    %c0_7 = arith.constant 0 : index
    %c0_8 = arith.constant 0 : index
    %7 = vector.load %arg5[%c0_6, %c0_7, %c0_8] : memref<1x3x256xf32, #tpu.memory_space<vmem>>, vector<1x3x256xf32>
    %8 = vector.shape_cast %7 : vector<1x3x256xf32> to vector<3x256xf32>
    %9 = vector.shape_cast %6 : vector<3x256xf32> to vector<1x3x256xf32>
    tpu.vector_store %arg5[%c0_6, %c0_7, %c0_8], %9 {strides = array<i32>} : memref<1x3x256xf32, #tpu.memory_space<vmem>>, vector<1x3x256xf32>,
    return
  }
  func.func @transform_0(%arg0: i32, %arg1: i32) -> (i32, i32) {
    %c0_i32 = arith.constant 0 : i32
    %c0_i32_0 = arith.constant 0 : i32
    %c0_i32_1 = arith.constant 0 : i32
    return %c0_i32, %c0_i32_0 : i32, i32
  }
  func.func @transform_1(%arg0: i32, %arg1: i32) -> (i32, i32) {
    %c0_i32 = arith.constant 0 : i32
    %c0_i32_0 = arith.constant 0 : i32
    %c0_i32_1 = arith.constant 0 : i32
    return %c0_i32, %c0_i32_0 : i32, i32
  }
  func.func @transform_2(%arg0: i32, %arg1: i32) -> (i32, i32, i32) {
    %c0_i32 = arith.constant 0 : i32
    %c0_i32_0 = arith.constant 0 : i32
    return %arg0, %c0_i32, %arg1 : i32, i32, i32
  }
  func.func @transform_3(%arg0: i32, %arg1: i32) -> (i32, i32, i32) {
    %c0_i32 = arith.constant 0 : i32
    %c0_i32_0 = arith.constant 0 : i32
    return %arg0, %c0_i32, %arg1 : i32, i32, i32
  }
}

</mosaic_0001>

<bundles_post_ra>
// kernel: outconv_forward.1
= control target key start
LH: loop header
LB: loop body
LE: loop exit
PB: predicated region body
PF: predicated region fallthrough
CT: control target
= control target key end

     0   :  { %s452_s12 = smov 0   ;;  %s454_s13 = smov 0   ;;  %s494_s0 = inlined_call_operand.vmem [shape: f32[3,4], index: 0, kind: input, shape index: {}]   ;;  %s495_s1 = inlined_call_operand.vmem [shape: f32[3,1], index: 1, kind: input, shape index: {}]   ;;  %s496_s2 = inlined_call_operand.vmem [shape: f32[2,4,256], index: 2, kind: input, shape index: {}]   ;;  %s497_s3 = inlined_call_operand.vmem [shape: f32[2,3,256], index: 3, kind: output, shape index: {}]  }
   0x1   :  { %s456_s14 = smov 0  }
   0x2 LB: > { %s25_s15 = sadd.s32 1, %s425_s13  ;;  %p368_p0 = scmp.ge.s32.totalorder %s429_s14, 1  ;;  %s429_s14 = sphi %s456_s14, %s13_s14   ;;  %s425_s13 = sphi %s454_s13, %s499_s13   ;;  %s421_s12 = sphi %s452_s12, %s498_s12  }
   0x3   : > { %p27_p1 = scmp.ge.s32.totalorder %s25_s15, 2  ;;  %p158_p2 = scmp.lt.s32.totalorder %s429_s14, 3 }
   0x5   : > { %s501_s15 = smov (%p27_p1, %s25_s15), 0  ;;  %p159_p3 = pnand %p368_p0, %p158_p2 }
   0x6   : > { %p191_p4 = scmp.lt.s32.totalorder (!%p159_p3), %s421_s12, 1 }
   0x7   : > { %162 = sbr.rel (%p159_p3) target bundleno = 157 (0x9d), region = 32 }
   0xc   : > { %v431_v0 = vmov 0   ;;  %v211_v1 = vld [vmem:[%s495_s1] sm:$0x7]  ;;  %s503_s12 = smov (!%p191_p4, %s421_s12), 1  ;;  %vm226_vm0 = vcmask 1043456   ;;  %vm222_vm1 = vcmask 31744  }
   0xd   : > { %406 = vset.pattern.permute.xlu0 %v431_v0  ;;  %s379_s18 = sshll.u32 %s503_s12, 3  ;;  %v210_v3 = vld [vmem:[%s494_s0] sm:$0x7] }
   0xe   : > { %215 = vperm.xlu0 %406, %v211_v1   ;;  %s198_s21 = scalar_lea.vmem %s496_s2, %s379_s18  ;;  %s208_s26 = scalar_lea.vmem %s497_s3, %s379_s18 }
   0xf   : > { %v212_v2 = vld [vmem:[%s198_s21] sm:$0xff] }
  0x10   : > { %219 = vst [vmem:[#allocation1] ss:$2 sm:$0xff] %v212_v2 }
  0x17   : > { %v220_v4 = vld.sshfl [vmem:[#allocation1] sm:$0xff pattern:$0x75316420]  ;;  %v221_v5 = vld.sshfl [vmem:[#allocation1 + $0x8] sm:$0xff pattern:$0x75316420] }
  0x18   : > { %373 = vmatpush.msk.msra.mxu0 %vm226_vm0, %v220_v4  ;;  %375 = vmatpush.msk.msra.mxu1 %vm226_vm0, %v221_v5 }
  0x19   : > { %374 = vmatmul.msk.f32.vlgmr.msra.gmra.mxu0 %vm222_vm1, %v210_v3  ;;  %376 = vmatmul.msk.f32.vlgmr.msra.gmra.mxu1 %vm222_vm1, %v210_v3 }
  0x80   : > { %v216_v6 = vpop.permute.xlu0 %215 }
  0x96   : > { %v248_v7 = vpop.f32.mrf.mxu0  ;;  %v268_v8 = vpop.f32.mrf.mxu1 }
  0x97   : > { %v269_v9 = vadd.f32 %v268_v8, %v216_v6  ;;  %v249_v10 = vadd.f32 %v248_v7, %v216_v6 }
  0x99   : > { %v273_v11 = vrot.slane %v269_v9, 4 }
  0x9b   : > { %v274_v12 = vsel %vm226_vm0, %v249_v10, %v273_v11 }
  0x9c   : > { %276 = vst [vmem:[%s208_s26] sm:$0x77] %v274_v12 }
  0x9d PF: > { %s13_s14 = sadd.s32 1, %s429_s14   ;;  %s498_s12 = smov %s425_s13 }
  0x9e   : > { %p10_p5 = scmp.ge.s32.totalorder %s13_s14, 4   ;;  %s499_s13 = smov %s501_s15 }
  0xa0   :  { %12 = sbr.rel (!%p10_p5) target bundleno = 2 (0x2), region = 62 }

</bundles_post_ra>
